<compile_context>
chip_gen: v7x
topology: tpu7x:2x2x1
jax: 0.10.0
libtpu: 0.0.40
codegen_flags: <defaults>
</compile_context>

<pallas_src>
import jax
import jax.numpy as jnp
from jax.experimental import pallas as pl
from jax.experimental.pallas import tpu as pltpu


def _encoding_kernel(x_ref, c_ref, cneg2s2_ref, aux_ref, o_ref, acc_ref):
    """One (batch, N-tile) grid step.

    x_ref       : (1, D, TN)  input slab, N on lanes
    c_ref       : (K, D)      codewords (for the aggregation correction)
    cneg2s2_ref : (K, D)      -2 * scale^2 * codewords (folded matmul weights)
    aux_ref     : (K, 2)      col 0 = scale^2, col 1 = scale^2 * ||C_k||^2
    o_ref       : (1, K, D)   output block (resident across the N-tile axis)
    acc_ref     : (K, D)      f32 VMEM accumulator
    """
    t = pl.program_id(1)

    @pl.when(t == 0)
    def _():
        acc_ref[...] = jnp.zeros_like(acc_ref)

    x = x_ref[0]                                          # (D, TN) f32
    # ||x_n||^2 per pixel  -> (1, TN)
    xsq = jnp.sum(x * x, axis=0, keepdims=True)
    # -2 * s2[k] * <C_k, x_n>  on the MXU  -> (K, TN)
    cross = jnp.dot(cneg2s2_ref[...], x,
                    preferred_element_type=jnp.float32)
    s2 = aux_ref[:, 0:1]                                  # (K, 1)
    bias = aux_ref[:, 1:2]                                # (K, 1)
    sl = s2 * xsq + cross + bias                          # (K, TN)

    # softmax over K (axis 0 == sublanes)
    m = jnp.max(sl, axis=0, keepdims=True)                # (1, TN)
    p = jnp.exp(sl - m)
    a = p / jnp.sum(p, axis=0, keepdims=True)             # (K, TN)

    # E += A @ X^T - (sum_n A) * C
    asum = jnp.sum(a, axis=1, keepdims=True)              # (K, 1)
    e = jax.lax.dot_general(a, x, (((1,), (1,)), ((), ())),
                            preferred_element_type=jnp.float32)   # (K, D)
    acc_ref[...] += e - asum * c_ref[...]

    @pl.when(t == pl.num_programs(1) - 1)
    def _():
        o_ref[0] = acc_ref[...].astype(o_ref.dtype)


def _pick_n_tile(n):
    """Largest lane-dense tile that evenly divides n (bounded for VMEM)."""
    for t in (512, 256, 128):
        if n % t == 0:
            return t
    return n  # fall back: whole-N block (equal to the full dim is legal)


def encoding_forward(x, codewords, scale):
    """x: (B, D, H, W) or (B, D, N); codewords: (K, D); scale: (K,).

    Returns E of shape (B, K, D), matching Encoding.forward.
    """
    if x.ndim == 4:
        B, D = x.shape[0], x.shape[1]
        n = x.shape[2] * x.shape[3]
        x3 = x.reshape(B, D, n)            # contiguous view, no HBM transpose
    elif x.ndim == 3:
        B, D, n = x.shape
        x3 = x
    else:
        raise RuntimeError('Encoding Layer unknown input dims!')
    K = codewords.shape[0]
    assert codewords.shape[1] == D

    x3 = x3.astype(jnp.float32)
    c = codewords.astype(jnp.float32)
    s2 = scale.astype(jnp.float32) ** 2                    # (K,)   scale^2
    csq = jnp.sum(c * c, axis=1)                           # (K,)   ||C_k||^2
    c_neg2s2 = (-2.0 * s2)[:, None] * c                    # (K, D) folded weights
    aux = jnp.stack([s2, s2 * csq], axis=1)                # (K, 2)

    tn = _pick_n_tile(n)
    nt = n // tn

    return pl.pallas_call(
        _encoding_kernel,
        out_shape=jax.ShapeDtypeStruct((B, K, D), jnp.float32),
        grid_spec=pltpu.PrefetchScalarGridSpec(
            num_scalar_prefetch=0,
            grid=(B, nt),
            in_specs=[
                pl.BlockSpec((1, D, tn), lambda b, t: (b, 0, t)),
                pl.BlockSpec((K, D), lambda b, t: (0, 0)),
                pl.BlockSpec((K, D), lambda b, t: (0, 0)),
                pl.BlockSpec((K, 2), lambda b, t: (0, 0)),
            ],
            out_specs=pl.BlockSpec((1, K, D), lambda b, t: (b, 0, 0)),
            scratch_shapes=[pltpu.VMEM((K, D), jnp.float32)],
        ),
        compiler_params=pltpu.CompilerParams(
            dimension_semantics=("parallel", "arbitrary")),
    )(x3, c, c_neg2s2, aux)


def _encoding_reference(x, codewords, scale):
    """Pure-JAX reference matching the PyTorch module exactly."""
    B, D = x.shape[0], x.shape[1]
    xf = x.reshape(B, D, -1).transpose(0, 2, 1)            # (B, N, D)
    diff = xf[:, :, None, :] - codewords[None, None, :, :]  # (B, N, K, D)
    sl = jnp.sum((scale[None, None, :, None] * diff) ** 2, axis=3)
    A = jax.nn.softmax(sl, axis=2)                          # (B, N, K)
    E = jnp.sum(A[..., None] * diff, axis=1)                # (B, K, D)
    return E


if __name__ == "__main__":
    key = jax.random.PRNGKey(0)
    kx1, kx2, kc, ks = jax.random.split(key, 4)

    B, D, K, H, W = 2, 32, 16, 16, 16
    std1 = 1.0 / float(K * D) ** 0.5
    codewords = jax.random.uniform(kc, (K, D), jnp.float32, -std1, std1)
    scale = jax.random.uniform(ks, (K,), jnp.float32, -1.0, 0.0)

    # 4-D input path: (B, D, H, W)
    x4 = jax.random.normal(kx1, (B, D, H, W), jnp.float32)
    out4 = encoding_forward(x4, codewords, scale)
    jax.block_until_ready(out4)
    assert out4.shape == (B, K, D), out4.shape
    ref4 = _encoding_reference(x4, codewords, scale)
    assert jnp.allclose(out4, ref4, atol=3e-2, rtol=3e-2), \
        float(jnp.max(jnp.abs(out4 - ref4)))

    # 3-D input path: (B, D, N) with N=384 -> exercises the accumulating
    # N-tile grid axis (3 tiles of 128).
    x3 = jax.random.normal(kx2, (B, D, 384), jnp.float32)
    out3 = encoding_forward(x3, codewords, scale)
    jax.block_until_ready(out3)
    assert out3.shape == (B, K, D), out3.shape
    ref3 = _encoding_reference(x3.reshape(B, D, 384), codewords, scale)
    assert jnp.allclose(out3, ref3, atol=3e-2, rtol=3e-2), \
        float(jnp.max(jnp.abs(out3 - ref3)))

    print("KERNEL_OK")
</pallas_src>

<mosaic_0001>
module attributes {stable_mosaic.version = 11 : i64} {
  func.func @_encoding_kernel(%arg0: i32, %arg1: i32, %arg2: memref<1x32x256xf32, #tpu.memory_space<vmem>>, %arg3: memref<16x32xf32, #tpu.memory_space<vmem>>, %arg4: memref<16x32xf32, #tpu.memory_space<vmem>>, %arg5: memref<16x2xf32, #tpu.memory_space<vmem>>, %arg6: memref<1x16x32xf32, #tpu.memory_space<vmem>>, %arg7: memref<16x32xf32, #tpu.memory_space<vmem>>) attributes {dimension_semantics = [#tpu.dimension_semantics<parallel>, #tpu.dimension_semantics<arbitrary>], iteration_bounds = array<i64: 2, 1>, scalar_prefetch = 0 : i64, scratch_operands = 1 : i64, tpu.core_type = #tpu.core_type<tc>, window_params = [{transform_indices = @transform_0, window_bounds = array<i64: 1, 32, 256>}, {pipeline_mode = #tpu.pipeline_mode<synchronous>, transform_indices = @transform_1, window_bounds = array<i64: 16, 32>}, {pipeline_mode = #tpu.pipeline_mode<synchronous>, transform_indices = @transform_2, window_bounds = array<i64: 16, 32>}, {pipeline_mode = #tpu.pipeline_mode<synchronous>, transform_indices = @transform_3, window_bounds = array<i64: 16, 2>}, {transform_indices = @transform_4, window_bounds = array<i64: 1, 16, 32>}]} {
    %c0_i32 = arith.constant 0 : i32
    %0 = arith.cmpi eq, %arg1, %c0_i32 : i32
    %1 = arith.extui %0 : i1 to i32
    %c0_i32_0 = arith.constant 0 : i32
    %2 = arith.cmpi ne, %1, %c0_i32_0 : i32
    scf.if %2 {
      %cst_21 = arith.constant 0.000000e+00 : f32
      %40 = vector.broadcast %cst_21 : f32 to vector<16x32xf32>
      %c0_22 = arith.constant 0 : index
      %c0_23 = arith.constant 0 : index
      %41 = vector.load %arg7[%c0_22, %c0_23] : memref<16x32xf32, #tpu.memory_space<vmem>>, vector<16x32xf32>
      tpu.vector_store %arg7[%c0_22, %c0_23], %40 {strides = array<i32>} : memref<16x32xf32, #tpu.memory_space<vmem>>, vector<16x32xf32>,
    } else {
    }
    %c0 = arith.constant 0 : index
    %c0_1 = arith.constant 0 : index
    %c0_2 = arith.constant 0 : index
    %3 = vector.load %arg2[%c0, %c0_1, %c0_2] : memref<1x32x256xf32, #tpu.memory_space<vmem>>, vector<1x32x256xf32>
    %4 = vector.shape_cast %3 : vector<1x32x256xf32> to vector<32x256xf32>
    %5 = arith.mulf %4, %4 : vector<32x256xf32>
    %cst = arith.constant dense<0.000000e+00> : vector<256xf32>
    %6 = vector.multi_reduction <add>, %5, %cst [0] : vector<32x256xf32> to vector<256xf32>
    %7 = vector.shape_cast %6 : vector<256xf32> to vector<1x256xf32>
    %c0_3 = arith.constant 0 : index
    %c0_4 = arith.constant 0 : index
    %8 = vector.load %arg4[%c0_3, %c0_4] : memref<16x32xf32, #tpu.memory_space<vmem>>, vector<16x32xf32>
    %cst_5 = arith.constant dense<0.000000e+00> : vector<16x256xf32>
    %9 = tpu.matmul %8, %4, %cst_5 {dimension_numbers = #tpu.dot_dimension_numbers<[1], [0], [0], [1], [0, 0, 1, 1], [], []>} : vector<16x32xf32>, vector<32x256xf32>, vector<16x256xf32> -> vector<16x256xf32>
    %c0_6 = arith.constant 0 : index
    %c0_7 = arith.constant 0 : index
    %10 = vector.load %arg5[%c0_6, %c0_7] : memref<16x2xf32, #tpu.memory_space<vmem>>, vector<16x1xf32>
    %c0_8 = arith.constant 0 : index
    %c1 = arith.constant 1 : index
    %11 = vector.load %arg5[%c0_8, %c1] : memref<16x2xf32, #tpu.memory_space<vmem>>, vector<16x1xf32>
    %12 = vector.broadcast %10 : vector<16x1xf32> to vector<16x256xf32>
    %13 = vector.broadcast %7 : vector<1x256xf32> to vector<16x256xf32>
    %14 = arith.mulf %12, %13 : vector<16x256xf32>
    %15 = arith.addf %14, %9 : vector<16x256xf32>
    %16 = vector.broadcast %11 : vector<16x1xf32> to vector<16x256xf32>
    %17 = arith.addf %15, %16 : vector<16x256xf32>
    %cst_9 = arith.constant dense<0xFF800000> : vector<256xf32>
    %18 = vector.multi_reduction <maximumf>, %17, %cst_9 [0] : vector<16x256xf32> to vector<256xf32>
    %19 = vector.shape_cast %18 : vector<256xf32> to vector<1x256xf32>
    %20 = vector.broadcast %19 : vector<1x256xf32> to vector<16x256xf32>
    %21 = arith.subf %17, %20 : vector<16x256xf32>
    %22 = math.exp %21 : vector<16x256xf32>
    %cst_10 = arith.constant dense<0.000000e+00> : vector<256xf32>
    %23 = vector.multi_reduction <add>, %22, %cst_10 [0] : vector<16x256xf32> to vector<256xf32>
    %24 = vector.shape_cast %23 : vector<256xf32> to vector<1x256xf32>
    %25 = vector.broadcast %24 : vector<1x256xf32> to vector<16x256xf32>
    %26 = arith.divf %22, %25 : vector<16x256xf32>
    %cst_11 = arith.constant dense<0.000000e+00> : vector<16xf32>
    %27 = vector.multi_reduction <add>, %26, %cst_11 [1] : vector<16x256xf32> to vector<16xf32>
    %28 = vector.shape_cast %27 : vector<16xf32> to vector<16x1xf32>
    %cst_12 = arith.constant dense<0.000000e+00> : vector<16x32xf32>
    %29 = tpu.matmul %26, %4, %cst_12 {dimension_numbers = #tpu.dot_dimension_numbers<[1], [1], [0], [0], [0, 0, 1, 0], [], []>} : vector<16x256xf32>, vector<32x256xf32>, vector<16x32xf32> -> vector<16x32xf32>
    %c0_13 = arith.constant 0 : index
    %c0_14 = arith.constant 0 : index
    %30 = vector.load %arg7[%c0_13, %c0_14] : memref<16x32xf32, #tpu.memory_space<vmem>>, vector<16x32xf32>
    %c0_15 = arith.constant 0 : index
    %c0_16 = arith.constant 0 : index
    %31 = vector.load %arg3[%c0_15, %c0_16] : memref<16x32xf32, #tpu.memory_space<vmem>>, vector<16x32xf32>
    %32 = vector.broadcast %28 : vector<16x1xf32> to vector<16x32xf32>
    %33 = arith.mulf %32, %31 : vector<16x32xf32>
    %34 = arith.subf %29, %33 : vector<16x32xf32>
    %35 = arith.addf %30, %34 : vector<16x32xf32>
    %c0_17 = arith.constant 0 : index
    %c0_18 = arith.constant 0 : index
    %36 = vector.load %arg7[%c0_17, %c0_18] : memref<16x32xf32, #tpu.memory_space<vmem>>, vector<16x32xf32>
    tpu.vector_store %arg7[%c0_17, %c0_18], %35 {strides = array<i32>} : memref<16x32xf32, #tpu.memory_space<vmem>>, vector<16x32xf32>,
    %c0_i32_19 = arith.constant 0 : i32
    %37 = arith.cmpi eq, %arg1, %c0_i32_19 : i32
    %38 = arith.extui %37 : i1 to i32
    %c0_i32_20 = arith.constant 0 : i32
    %39 = arith.cmpi ne, %38, %c0_i32_20 : i32
    scf.if %39 {
      %c0_21 = arith.constant 0 : index
      %c0_22 = arith.constant 0 : index
      %40 = vector.load %arg7[%c0_21, %c0_22] : memref<16x32xf32, #tpu.memory_space<vmem>>, vector<16x32xf32>
      %c0_23 = arith.constant 0 : index
      %c0_24 = arith.constant 0 : index
      %c0_25 = arith.constant 0 : index
      %41 = vector.load %arg6[%c0_23, %c0_24, %c0_25] : memref<1x16x32xf32, #tpu.memory_space<vmem>>, vector<1x16x32xf32>
      %42 = vector.shape_cast %41 : vector<1x16x32xf32> to vector<16x32xf32>
      %43 = vector.shape_cast %40 : vector<16x32xf32> to vector<1x16x32xf32>
      tpu.vector_store %arg6[%c0_23, %c0_24, %c0_25], %43 {strides = array<i32>} : memref<1x16x32xf32, #tpu.memory_space<vmem>>, vector<1x16x32xf32>,
    } else {
    }
    return
  }
  func.func @transform_0(%arg0: i32, %arg1: i32) -> (i32, i32, i32) {
    %c0_i32 = arith.constant 0 : i32
    %c0_i32_0 = arith.constant 0 : i32
    return %arg0, %c0_i32, %arg1 : i32, i32, i32
  }
  func.func @transform_1(%arg0: i32, %arg1: i32) -> (i32, i32) {
    %c0_i32 = arith.constant 0 : i32
    %c0_i32_0 = arith.constant 0 : i32
    %c0_i32_1 = arith.constant 0 : i32
    return %c0_i32, %c0_i32_0 : i32, i32
  }
  func.func @transform_2(%arg0: i32, %arg1: i32) -> (i32, i32) {
    %c0_i32 = arith.constant 0 : i32
    %c0_i32_0 = arith.constant 0 : i32
    %c0_i32_1 = arith.constant 0 : i32
    return %c0_i32, %c0_i32_0 : i32, i32
  }
  func.func @transform_3(%arg0: i32, %arg1: i32) -> (i32, i32) {
    %c0_i32 = arith.constant 0 : i32
    %c0_i32_0 = arith.constant 0 : i32
    %c0_i32_1 = arith.constant 0 : i32
    return %c0_i32, %c0_i32_0 : i32, i32
  }
  func.func @transform_4(%arg0: i32, %arg1: i32) -> (i32, i32, i32) {
    %c0_i32 = arith.constant 0 : i32
    %c0_i32_0 = arith.constant 0 : i32
    %c0_i32_1 = arith.constant 0 : i32
    return %arg0, %c0_i32, %c0_i32_0 : i32, i32, i32
  }
}

</mosaic_0001>

<bundles_post_ra>
// kernel: tpu_custom_call.1
= control target key start
LH: loop header
LB: loop body
LE: loop exit
PB: predicated region body
PF: predicated region fallthrough
CT: control target
= control target key end

     0   :  { %9 = vsyncpa [#allocation4], 0  ;;  %s1218_s0 = inlined_call_operand.hbm [shape: f32[2,32,256], index: 0, kind: input, shape index: {}]   ;;  %s1219_s1 = inlined_call_operand.vmem [shape: f32[16,32], index: 1, kind: input, shape index: {}]   ;;  %s1220_s2 = inlined_call_operand.hbm [shape: f32[16,32], index: 2, kind: input, shape index: {}]   ;;  %s1221_s3 = inlined_call_operand.vmem [shape: f32[16,2], index: 3, kind: input, shape index: {}]   ;;  %s1222_s4 = inlined_call_operand.hbm [shape: f32[2,16,32], index: 4, kind: output, shape index: {}]  }
   0x1   :  { %11 = vsyncpa [#allocation4 + $0x1], 0 }
   0x2   :  { %12 = vsyncpa [#allocation7], 0 }
   0x3   :  { %13 = vsyncpa [#allocation5], 0 }
   0x4   :  { %15 = vsyncpa [#allocation5 + $0x1], 0  ;;  %s978_s15 = smov 0   ;;  %s980_s16 = smov 0  }
   0x5   :  { %s982_s17 = smov 0   ;;  %s984_s18 = smov 0  }
   0x6   :  { %s986_s19 = smov 0   ;;  %s988_s20 = smov 0  }
   0x7 LB: > { %s661_s21 = sadd.s32 4294967295, %s939_s20   ;;  %s662_s22 = sadd.s32 4294967294, %s939_s20   ;;  %s939_s20 = sphi %s988_s20, %s21_s20   ;;  %s935_s19 = sphi %s986_s19, %s1246_s19   ;;  %s931_s18 = sphi %s984_s18, %s1245_s18   ;;  %s927_s17 = sphi %s982_s17, %s1244_s17   ;;  %s923_s16 = sphi %s980_s16, %s1243_s16   ;;  %s919_s15 = sphi %s978_s15, %s1242_s15  }
   0x8   : > { %p55_p0 = scmp.ne.s32.totalorder %s923_s16, %s919_s15  ;;  %p1012_p1 = scmp.eq.s32.totalorder %s661_s21, 0 }
   0x9   : > { %p1016_p2 = scmp.eq.s32.totalorder %s661_s21, 1  ;;  %p148_p3 = scmp.eq.s32.totalorder %s662_s22, 1 }
   0xa   : > { %s1227_s23 = scalar_select %p1012_p1, 1, 0 }
   0xb   : > { %s1228_s24 = scalar_select %p1016_p2, 1, 0 }
   0xc   : > { %p1022_p4 = por %p1012_p1, %p55_p0  ;;  %p663_p5 = scmp.ge.s32.totalorder %s939_s20, 1 }
   0xd   : > { %p1027_p6 = por %p148_p3, %p55_p0  ;;  %p155_p7 = scmp.lt.s32.totalorder %s939_s20, 3 }
   0xe   : > { %s1229_s25 = scalar_select %p1022_p4, 1, 0 }
   0xf   : > { %s1230_s26 = scalar_select %p1027_p6, 1, 0 }
  0x10   : > { %p1032_p8 = pnand %p663_p5, %p155_p7  ;;  %s941_s28 = smov [#allocation6]  }
  0x11   : > { %s170_s29 = sshll.u32 %s941_s28, 4  ;;  %s33_s5 = sadd.s32 1, %s935_s19  ;;  %s171_s29 = int_to_ptr.vmem [resolvable:$true] %s170_s29 }
  0x12   : > { %s1231_s27 = scalar_select %p1032_p8, 1, 0 }
  0x13   : > { %p706_p9 = pneg %p1032_p8  ;;  %s795_s8 = scalar_lea.hbm %s1220_s2, 256 }
  0x14   : > { %p796_p12 = scmp.ne.s32.totalorder %s1220_s2, %s795_s8  ;;  %p802_p5 = scmp.lt.u32.totalorder %s795_s8, %s1220_s2 }
  0x15   : > { %p1041_p11 = pnand %p706_p9, %p1012_p1 }
  0x17   : > { %p797_p13 = pneg %p1041_p11 }
  0x19   : > { %p798_p0 = pnand %p797_p13, %p796_p12 }
  0x1b   : > { %p799_p3 = pneg %p798_p0 }
  0x1d   : > { %p804_p7 = pnand %p802_p5, %p799_p3 }
  0x1f   : > { %807 = shalt.err (!%p804_p7)
}
  0x20   : > { %s808_s13 = scalar_lea.vmem %s171_s29, 256  ;;  %p816_p1 = scmp.lt.s32.totalorder %s171_s29, %s171_s29 }
  0x21   : > { %p809_p9 = scmp.ne.s32.totalorder %s171_s29, %s808_s13  ;;  %p817_p4 = scmp.lt.s32.totalorder %s808_s13, %s808_s13 }
  0x23   : > { %p811_p10 = pnand %p809_p9, %p797_p13  ;;  %p818_p8 = por %p817_p4, %p816_p1 }
  0x25   : > { %p812_p6 = pneg %p811_p10 }
  0x27   : > { %p819_p2 = pnand %p818_p8, %p812_p6 }
  0x29   : > { %822 = shalt.err (!%p819_p2)
}
  0x2a   : > { %s942_s14 = smov 128   ;;  %s943_s21 = smov 8  }
  0x2b   : > { %709 = dma.hbm_to_vmem [thread:$0]  (!%p1041_p11), %s1220_s2, 256, %s171_s29, [#allocation7], %s942_s14, %s942_s14, %s943_s21  }
  0x2c   : > { %p35_p1 = scmp.ge.s32.totalorder %s33_s5, 2  ;;  %s42_s6 = sadd.s32 1, %s927_s17 }
  0x2d   : > { %p49_p2 = scmp.ne.s32.totalorder %s927_s17, %s923_s16  ;;  %p50_p4 = scmp.eq.s32.totalorder %s939_s20, 0 }
  0x2e   : > { %s1248_s5 = smov (%p35_p1, %s33_s5), 0  ;;  %p1234_p8 = scmp.ne.s32.totalorder %s1228_s24, 0 }
  0x2f   : > { %p1068_p6 = por %p50_p4, %p49_p2  ;;  %s37_s30 = ssub.s32 %s935_s19, %s1248_s5 }
  0x30   : > { %p1074_p10 = por %p1234_p8, %p49_p2  ;;  %p719_p12 = scmp.lt.s32.totalorder %s939_s20, 2 }
  0x31   : > { %p40_p11 = scmp.eq.s32.totalorder %s37_s30, 0  ;;  %s187_s29 = sand.u32 1, %s927_s17  }
  0x32   : > { %s666_s9 = sshll.u32 %s187_s29, 6  ;;  %s680_s11 = sshll.u32 %s935_s19, 10 }
  0x33   : > { %s1083_s10 = scalar_select %p40_p11, %s927_s17, %s42_s6  }
  0x34   : > { %s1089_s14 = scalar_lea.hbm %s1218_s0, %s680_s11  ;;  %s191_s24 = scalar_lea.vmem [#allocation3], %s666_s9 }
  0x35   : > { %s200_s21 = sshll.u32 %s191_s24, 4  ;;  %p1095_p13 = pnand %p719_p12, %p1068_p6  ;;  %s1091_s21 = int_to_ptr.vmem [resolvable:$true] %s200_s21 }
  0x36   : > { %s1099_s28 = scalar_lea.sflag [#allocation4], %s187_s29  ;;  %s823_s6 = scalar_lea.hbm %s1089_s14, 1024 }
  0x37   : > { %p824_p0 = scmp.ne.s32.totalorder %s1089_s14, %s823_s6  ;;  %p825_p3 = pneg %p1095_p13 }
  0x38   : > { %s828_s7 = scalar_lea.hbm %s1218_s0, 2048  ;;  %p829_p9 = scmp.lt.u32.totalorder %s1089_s14, %s1218_s0 }
  0x39   : > { %p826_p5 = pnand %p825_p3, %p824_p0  ;;  %p830_p1 = scmp.lt.u32.totalorder %s828_s7, %s823_s6 }
  0x3a   : > { %p832_p4 = scmp.lt.u32.totalorder %s823_s6, %s1089_s14 }
  0x3b   : > { %p827_p7 = pneg %p826_p5  ;;  %p831_p2 = por %p830_p1, %p829_p9 }
  0x3d   : > { %p833_p6 = por %p832_p4, %p831_p2 }
  0x3f   : > { %p834_p8 = pnand %p833_p6, %p827_p7 }
  0x41   : > { %837 = shalt.err (!%p834_p8)
}
  0x42   : > { %s838_s29 = scalar_lea.vmem %s1091_s21, 1024  ;;  %s944_s13 = smov [#allocation3]  }
  0x43   : > { %p839_p12 = scmp.ne.s32.totalorder %s1091_s21, %s838_s29  ;;  %s843_s24 = sshll.u32 %s944_s13, 4  ;;  %s844_s24 = int_to_ptr.vmem [resolvable:$false] %s843_s24 }
  0x44   : > { %s845_s30 = scalar_lea.vmem %s844_s24, 2048  ;;  %p846_p5 = scmp.lt.s32.totalorder %s1091_s21, %s844_s24 }
  0x45   : > { %p841_p11 = pnand %p839_p12, %p825_p3  ;;  %p847_p9 = scmp.lt.s32.totalorder %s845_s30, %s838_s29 }
  0x47   : > { %p842_p0 = pneg %p841_p11  ;;  %p848_p1 = por %p847_p9, %p846_p5 }
  0x49   : > { %p849_p2 = pnand %p848_p1, %p842_p0 }
  0x4b   : > { %852 = shalt.err (!%p849_p2)
}
  0x4c   : > { %s945_s6 = smov 256   ;;  %s946_s9 = smov 16  }
  0x4d   : > { %713 = dma.hbm_to_vmem [thread:$0]  (!%p1095_p13), %s1089_s14, 1024, %s1091_s21, %s1099_s28, %s945_s6, %s945_s6, %s946_s9  }
  0x4e   : > { %p1237_p3 = scmp.ne.s32.totalorder %s1231_s27, 0 }
  0x4f   : > { %s1130_s7 = sand.u32 (!%p1237_p3), 1, %s923_s16   ;;  %p1238_p7 = scmp.ne.s32.totalorder (!%p1237_p3), %s1229_s25, 0 }
  0x50   : > { %212 = sbr.rel (%p1237_p3) target bundleno = 626 (0x272), region = 36  ;;  %s670_s11 = sshll.u32 (!%p1237_p3), %s1130_s7, 6 }
  0x51   : > { %s215_s12 = scalar_lea.sflag (!%p1237_p3), [#allocation4], %s1130_s7  ;;  %s218_s29 = scalar_lea.vmem (!%p1237_p3), [#allocation3], %s670_s11 }
  0x57   : > { %906 = dma.done.wait (%p1238_p7), %s215_s12, 1024  }
  0x58   : > { %908 = vsyncadd (%p1238_p7), %s215_s12, 4294966272  ;;  %p1239_p4 = scmp.ne.s32.totalorder %s1227_s23, 0 }
  0x5a   : > { %910 = dma.done.wait (%p1239_p4), [#allocation7], 256  }
  0x5b   : > { %912 = vsyncadd (%p1239_p4), [#allocation7], 4294967040  ;;  %vm252_vm0 = vcmask 261120   ;;  %v947_v0 = vmov 0.0   ;;  %v948_v1 = vmov 0   ;;  %v949_v2 = vmov 1  }
  0x5c   : > { %253 = vst.msk [vmem:[#allocation2] sm:$0xff] %vm252_vm0, %v947_v0  ;;  %254 = vst.msk [vmem:[#allocation2 + $0x8] sm:$0xff] %vm252_vm0, %v947_v0  ;;  %362 = vmatprep.mubr.f32.mxu0 %v947_v0  ;;  %780 = vset.pattern.permute.xlu0 %v948_v1  ;;  %v256_v3 = vld [vmem:[%s218_s29 + $0x8] sm:$0xff]  ;;  %v258_v4 = vld [vmem:[%s218_s29 + $0x18] sm:$0xff]  ;;  %s672_s24 = sshll.u32 %s1130_s7, 4  ;;  %s681_s30 = sshll.u32 %s931_s18, 8 }
  0x5d   : > { %781 = vset.pattern.permute.xlu1 %v949_v2  ;;  %v255_v5 = vld [vmem:[%s218_s29] sm:$0xff]  ;;  %v264_v6 = vmul.f32 %v256_v3, %v256_v3  ;;  %v266_v7 = vmul.f32 %v258_v4, %v258_v4  ;;  %v682_v8 = vpack.c.bf16 %v258_v4, %v256_v3  ;;  %v257_v9 = vld [vmem:[%s218_s29 + $0x10] sm:$0xff]  ;;  %v260_v11 = vld [vmem:[%s218_s29 + $0x28] sm:$0xff]  ;;  %s246_s6 = scalar_lea.vmem [#allocation8], %s672_s24  ;;  %s554_s23 = scalar_lea.sflag [#allocation5], %s1130_s7 }
  0x5e   : > { %v263_v10 = vmul.f32 %v255_v5, %v255_v5  ;;  %v262_v12 = vld [vmem:[%s218_s29 + $0x38] sm:$0xff]  ;;  %v265_v13 = vmul.f32 %v257_v9, %v257_v9  ;;  %v684_v14 = vpack.c.bf16 %v257_v9, %v255_v5  ;;  %v268_v15 = vmul.f32 %v260_v11, %v260_v11  ;;  %v259_v16 = vld [vmem:[%s218_s29 + $0x20] sm:$0xff]  ;;  %v261_v17 = vld [vmem:[%s218_s29 + $0x30] sm:$0xff]  ;;  %s567_s9 = sshll.u32 %s246_s6, 4  ;;  %s1166_s29 = scalar_lea.hbm %s1222_s4, %s681_s30  ;;  %s1168_s9 = int_to_ptr.vmem [resolvable:$true] %s567_s9 }
  0x5f   : > { %v280_v18 = vadd.f32 %v266_v7, %v264_v6  ;;  %683 = vmatprep.subr.bf16.mxu0 %v682_v8  ;;  %v270_v19 = vmul.f32 %v262_v12, %v262_v12  ;;  %v686_v20 = vpack.c.bf16 %v262_v12, %v260_v11  ;;  %v267_v21 = vmul.f32 %v259_v16, %v259_v16  ;;  %v375_v22 = vld [vmem:[%s1221_s3] sm:$0xff]  ;;  %v376_v27 = vld [vmem:[%s1221_s3 + $0x8] sm:$0xff]  ;;  %v289_v31 = vld [vmem:[#allocation6] sm:$0xff]  ;;  %s853_s18 = scalar_lea.vmem %s1168_s9, 256  ;;  %s950_s25 = smov [#allocation8]  }
  0x60   : > { %v271_v23 = vadd.f32 %v265_v13, %v263_v10  ;;  %685 = vmatpush1.bf16.msra.mxu0 %v684_v14  ;;  %v269_v24 = vmul.f32 %v261_v17, %v261_v17  ;;  %v688_v25 = vpack.c.bf16 %v261_v17, %v259_v16  ;;  %379 = vperm.xlu0 %780, %v375_v22   ;;  %v290_v32 = vld [vmem:[#allocation6 + $0x8] sm:$0xff]  ;;  %p854_p13 = scmp.ne.s32.totalorder %s1168_s9, %s853_s18  ;;  %s857_s27 = sshll.u32 %s950_s25, 4  ;;  %s858_s27 = int_to_ptr.vmem [resolvable:$false] %s857_s27 }
  0x61   : > { %v281_v26 = vadd.f32 %v280_v18, %v268_v15  ;;  %687 = vmatprep.subr.bf16.mxu0 %v686_v20  ;;  %396 = vperm.xlu1 %781, %v375_v22   ;;  %s859_s14 = scalar_lea.vmem %s858_s27, 512  ;;  %p860_p12 = scmp.lt.s32.totalorder %s1168_s9, %s858_s27 }
  0x62   : > { %v272_v28 = vadd.f32 %v271_v23, %v267_v21  ;;  %691 = vmatprep.subr.bf16.mxu1 %v682_v8  ;;  %p855_p6 = pnand %p854_p13, %p1074_p10  ;;  %p861_p11 = scmp.lt.s32.totalorder %s859_s14, %s853_s18 }
  0x63   : > { %v282_v29 = vadd.f32 %v281_v26, %v270_v19  ;;  %693 = vmatpush1.bf16.xpose.msra.mxu1 %v684_v14 }
  0x64   : > { %v273_v30 = vadd.f32 %v272_v28, %v269_v24  ;;  %689 = vmatpush1.bf16.msra.mxu0 %v688_v25  ;;  %384 = vperm.xlu0 %780, %v376_v27   ;;  %p856_p8 = pneg %p855_p6  ;;  %p862_p0 = por %p861_p11, %p860_p12 }
  0x65   : > { %400 = vperm.xlu1 %781, %v376_v27   ;;  %695 = vmatprep.subr.bf16.mxu1 %v686_v20  ;;  %v283_v34 = vrot.slane %v282_v29, 4 }
  0x66   : > { %v274_v33 = vrot.slane %v273_v30, 4  ;;  %p863_p5 = pnand %p862_p0, %p856_p8 }
  0x67   : > { %673 = vmatmul.mubr.msk.f32.vlgmr.msra.gmra.mrb[0].mxu0 %vm252_vm0, %v289_v31  ;;  %v284_v36 = vadd.f32 %v283_v34, %v282_v29 }
  0x68   : > { %368 = vmatprep.mubr.f32.mxu0 %v947_v0  ;;  %782 = vset.pattern.permute.xlu0 %v949_v2  ;;  %v275_v35 = vadd.f32 %v274_v33, %v273_v30 }
  0x69   : > { %v285_v38 = vrot.slane %v284_v36, 2 }
  0x6a   : > { %v276_v37 = vrot.slane %v275_v35, 2 }
  0x6b   : > { %674 = vmatmul.mubr.msk.f32.gmra.mrb[2].mxu0 %vm252_vm0, %v290_v32  ;;  %697 = vmatpush1.bf16.xpose.msra.mxu1 %v688_v25  ;;  %v286_v40 = vadd.f32 %v285_v38, %v284_v36 }
  0x6c   : > { %v277_v39 = vadd.f32 %v276_v37, %v275_v35 }
  0x6d   : > { %v287_v42 = vrot.slane %v286_v40, 1 }
  0x6e   : > { %v278_v41 = vrot.slane %v277_v39, 1 }
  0x6f   : > { %v288_v45 = vadd.f32 %v287_v42, %v286_v40 }
  0x70   : > { %v279_v43 = vadd.f32 %v278_v41, %v277_v39 }
  0xdf   : > { %v380_v44 = vpop.permute.xlu0 %379 }
  0xe0   : > { %v387_v46 = vmul.f32 %v380_v44, %v279_v43  ;;  %v388_v47 = vmul.f32 %v380_v44, %v288_v45  ;;  %v397_v48 = vpop.permute.xlu1 %396 }
  0xe3   : > { %v385_v49 = vpop.permute.xlu0 %384 }
  0xe4   : > { %v389_v54 = vmul.f32 %v385_v49, %v279_v43  ;;  %v390_v55 = vmul.f32 %v385_v49, %v288_v45  ;;  %v401_v59 = vpop.permute.xlu1 %400  ;;  %v536_v49 = vld [vmem:[%s1219_s1] sm:$0xff] }
 0x13a   : > { %v364_v50 = vpop.f32.mrb[0].mxu0 }
 0x13b   : > { %v391_v51 = vadd.f32 %v387_v46, %v364_v50  ;;  %v366_v52 = vpop.f32.mrb[1].mxu0 }
 0x13c   : > { %v392_v53 = vadd.f32 %v388_v47, %v366_v52  ;;  %v537_v52 = vld [vmem:[%s1219_s1 + $0x8] sm:$0xff] }
 0x13d   : > { %v403_v61 = vadd.f32 %v397_v48, %v391_v51 }
 0x13e   : > { %v370_v56 = vpop.f32.mrb[2].mxu0  ;;  %v404_v63 = vadd.f32 %v397_v48, %v392_v53 }
 0x13f   : > { %v393_v57 = vadd.f32 %v389_v54, %v370_v56  ;;  %v372_v58 = vpop.f32.mrb[3].mxu0 }
 0x140   : > { %v394_v60 = vadd.f32 %v390_v55, %v372_v58  ;;  %v534_v55 = vld [vmem:[#allocation2] sm:$0xff] }
 0x141   : > { %v405_v62 = vadd.f32 %v401_v59, %v393_v57 }
 0x142   : > { %v406_v0 = vadd.f32 %v401_v59, %v394_v60 }
 0x143   : > { %v407_v1 = vmax.f32 %v403_v61, %v405_v62 }
 0x144   : > { %v414_v2 = vmax.f32 %v404_v63, %v406_v0 }
 0x145   : > { %v408_v3 = vrot.slane %v407_v1, 4 }
 0x146   : > { %v415_v4 = vrot.slane %v414_v2, 4 }
 0x147   : > { %v409_v5 = vmax.f32 %v407_v1, %v408_v3 }
 0x148   : > { %v416_v6 = vmax.f32 %v414_v2, %v415_v4 }
 0x149   : > { %v410_v7 = vrot.slane %v409_v5, 2 }
 0x14a   : > { %v417_v8 = vrot.slane %v416_v6, 2 }
 0x14b   : > { %v411_v9 = vmax.f32 %v409_v5, %v410_v7 }
 0x14c   : > { %v418_v10 = vmax.f32 %v416_v6, %v417_v8 }
 0x14d   : > { %v412_v11 = vrot.slane %v411_v9, 1 }
 0x14e   : > { %v419_v12 = vrot.slane %v418_v10, 1 }
 0x14f   : > { %v413_v13 = vmax.f32 %v411_v9, %v412_v11 }
 0x150   : > { %v420_v14 = vmax.f32 %v418_v10, %v419_v12 }
 0x151   : > { %v421_v15 = vsub.f32 %v403_v61, %v413_v13  ;;  %v423_v16 = vsub.f32 %v405_v62, %v413_v13  ;;  %v535_v61 = vld [vmem:[#allocation2 + $0x8] sm:$0xff] }
 0x152   : > { %v422_v17 = vsub.f32 %v404_v63, %v420_v14  ;;  %v424_v18 = vsub.f32 %v406_v0, %v420_v14 }
 0x153   : > { %v425_v19 = vmul.f32 1.442695, %v421_v15  ;;  %v429_v20 = vmul.f32 1.442695, %v423_v16 }
 0x154   : > { %v427_v21 = vmul.f32 1.442695, %v422_v17  ;;  %v431_v22 = vmul.f32 1.442695, %v424_v18 }
 0x155   : > { %783 = vpow2.f32 %v425_v19 }
 0x156   : > { %785 = vpow2.f32 %v429_v20 }
 0x157   : > { %787 = vpow2.f32 %v427_v21 }
 0x158   : > { %789 = vpow2.f32 %v431_v22 }
 0x15f   : > { %v784_v23 = vpop.eup %783 }
 0x160   : > { %v786_v24 = vpop.eup %785 }
 0x161   : > { %v788_v25 = vpop.eup %787  ;;  %v433_v26 = vadd.f32 %v786_v24, %v784_v23 }
 0x162   : > { %v790_v27 = vpop.eup %789 }
 0x163   : > { %v434_v28 = vrot.slane %v433_v26, 4  ;;  %v440_v29 = vadd.f32 %v790_v27, %v788_v25 }
 0x165   : > { %v435_v30 = vadd.f32 %v434_v28, %v433_v26  ;;  %v441_v31 = vrot.slane %v440_v29, 4 }
 0x167   : > { %v442_v32 = vadd.f32 %v441_v31, %v440_v29  ;;  %v436_v33 = vrot.slane %v435_v30, 2 }
 0x169   : > { %v443_v34 = vrot.slane %v442_v32, 2  ;;  %v437_v35 = vadd.f32 %v436_v33, %v435_v30 }
 0x16b   : > { %v444_v36 = vadd.f32 %v443_v34, %v442_v32  ;;  %v438_v37 = vrot.slane %v437_v35, 1 }
 0x16d   : > { %v445_v38 = vrot.slane %v444_v36, 1  ;;  %v439_v39 = vadd.f32 %v438_v37, %v437_v35 }
 0x16f   : > { %v446_v40 = vadd.f32 %v445_v38, %v444_v36  ;;  %791 = vrcp.f32 %v439_v39 }
 0x171   : > { %793 = vrcp.f32 %v446_v40 }
 0x179   : > { %v792_v41 = vpop.eup %791 }
 0x17a   : > { %v448_v42 = vmul.f32 %v792_v41, %v784_v23  ;;  %v451_v43 = vmul.f32 %v792_v41, %v786_v24 }
 0x17b   : > { %v794_v44 = vpop.eup %793 }
 0x17c   : > { %v450_v45 = vmul.f32 %v794_v44, %v788_v25  ;;  %v452_v46 = vmul.f32 %v794_v44, %v790_v27 }
 0x17e   : > { %523 = vmatprep.mubr.f32.mxu1 %v450_v45  ;;  %v456_v47 = vadd.f32 %v452_v46, %v451_v43  ;;  %v453_v48 = vadd.f32 %v450_v45, %v448_v42 }
 0x17f   : > { %524 = vmatmul.mubr.f32.vlgmr.msra.gmra.mrb[0].mxu1 %v448_v42 }
 0x180   : > { %457 = vadd.xlane.f32.xlu1 %v456_v47  ;;  %528 = vmatprep.mubr.f32.mxu1 %v452_v46 }
 0x181   : > { %454 = vadd.xlane.f32.xlu0 %v453_v48 }
 0x183   : > { %529 = vmatmul.mubr.f32.gmra.mrb[2].mxu1 %v451_v43 }
 0x20d   : > { %v458_v53 = vpop.xlane.xlu1 %457 }
 0x20e   : > { %v455_v50 = vpop.xlane.xlu0 %454  ;;  %v539_v58 = vmul.f32 %v537_v52, %v458_v53 }
 0x20f   : > { %v538_v51 = vmul.f32 %v536_v49, %v455_v50 }
 0x252   : > { %v525_v54 = vpop.f32.mrb[0].mxu1 }
 0x253   : > { %v540_v56 = vsub.f32 %v525_v54, %v538_v51  ;;  %v527_v57 = vpop.f32.mrb[1].mxu1 }
 0x255   : > { %v542_v59 = vadd.f32 %v540_v56, %v534_v55 }
 0x256   : > { %v530_v60 = vpop.f32.mrb[2].mxu1 }
 0x257   : > { %544 = vst.msk [vmem:[#allocation2] sm:$0xff] %vm252_vm0, %v542_v59  ;;  %v541_v62 = vsub.f32 %v530_v60, %v539_v58  ;;  %v532_v63 = vpop.f32.mrb[3].mxu1 }
 0x259   : > { %v543_v0 = vadd.f32 %v541_v62, %v535_v61 }
 0x25b   : > { %545 = vst.msk [vmem:[#allocation2 + $0x8] sm:$0xff] %vm252_vm0, %v543_v0 }
 0x25e   : > { %v549_v1 = vld [vmem:[#allocation2] sm:$0xff] }
 0x25f   : > { %551 = vst.msk [vmem:[%s246_s6] sm:$0xff] %vm252_vm0, %v549_v1 }
 0x262   : > { %v550_v2 = vld [vmem:[#allocation2 + $0x8] sm:$0xff] }
 0x263   : > { %552 = vst.msk [vmem:[%s246_s6 + $0x8] sm:$0xff] %vm252_vm0, %v550_v2 }
 0x264   : > { %866 = shalt.err (!%p863_p5)
}
 0x265   : > { %s867_s21 = scalar_lea.hbm %s1166_s29, 256  ;;  %s871_s13 = scalar_lea.hbm %s1222_s4, 512 }
 0x266   : > { %p868_p9 = scmp.ne.s32.totalorder %s1166_s29, %s867_s21  ;;  %p872_p3 = scmp.lt.u32.totalorder %s1166_s29, %s1222_s4 }
 0x267   : > { %p873_p7 = scmp.lt.u32.totalorder %s871_s13, %s867_s21  ;;  %p875_p13 = scmp.lt.u32.totalorder %s867_s21, %s1166_s29 }
 0x268   : > { %p869_p1 = pnand %p868_p9, %p1074_p10 }
 0x269   : > { %p874_p4 = por %p873_p7, %p872_p3 }
 0x26a   : > { %p870_p2 = pneg %p869_p1 }
 0x26b   : > { %p876_p6 = por %p875_p13, %p874_p4 }
 0x26d   : > { %p877_p8 = pnand %p876_p6, %p870_p2 }
 0x26f   : > { %880 = shalt.err (!%p877_p8)
}
 0x270   : > { %s951_s6 = smov 128   ;;  %s952_s11 = smov 8  }
 0x271   : > { %704 = dma.vmem_to_hbm [thread:$0]  (%p1074_p10), %s1168_s9, 256, %s1166_s29, %s554_s23, %s951_s6, %s951_s6, %s952_s11  }
 0x272 PF: > { %s582_s12 = sand.u32 1, %s919_s15   ;;  %p1240_p12 = scmp.ne.s32.totalorder %s1230_s26, 0 }
 0x273   : > { %p1241_p11 = scmp.ge.s32.totalorder %s939_s20, 2  ;;  %s583_s18 = scalar_lea.sflag [#allocation5], %s582_s12 }
 0x275   : > { %p715_p0 = pnand %p1241_p11, %p1240_p12 }
 0x277   : > { %914 = dma.done.wait (!%p715_p0), %s583_s18, 256  }
 0x278   : > { %916 = vsyncadd (!%p715_p0), %s583_s18, 4294967040  ;;  %s21_s20 = sadd.s32 1, %s939_s20   ;;  %s1242_s15 = smov %s923_s16 }
 0x279   : > { %p18_p5 = scmp.ge.s32.totalorder %s21_s20, 4   ;;  %s1243_s16 = smov %s927_s17 }
 0x27a   : > { %s1244_s17 = smov %s1083_s10  ;;  %s1245_s18 = smov %s935_s19 }
 0x27b   : > { %s1246_s19 = smov %s1248_s5  ;;  %20 = sbr.rel (!%p18_p5) target bundleno = 7 (0x7), region = 93 }
 0x282   :  { %588 = vsyncpa [#allocation4], 1 }
 0x283   :  { %590 = vsyncpa [#allocation4 + $0x1], 1 }
 0x284   :  { %591 = vsyncpa [#allocation7], 1 }
 0x285   :  { %592 = vsyncpa [#allocation5], 1 }
 0x286   :  { %594 = vsyncpa [#allocation5 + $0x1], 1 }

</bundles_post_ra>
